<compile_context>
chip_gen: v5e
topology: v5e:2x2
jax: 0.10.0
libtpu: 0.0.40
codegen_flags: <defaults>
</compile_context>

<pallas_src>
import jax
import jax.numpy as jnp
from jax.experimental import pallas as pl
from jax.experimental.pallas import tpu as pltpu

EPS = 1e-5   # nn.BatchNorm1d default
PAD = 128    # lane width; all feature dims are zero-padded to this


def _linear(h, w, b):
    return jnp.dot(h, w, preferred_element_type=jnp.float32) + b


def _bn_relu(h, g, be):
    # BatchNorm1d (training mode): per-feature batch mean / biased variance.
    # Padded (all-zero) columns give mean=0, var=0 -> stay exactly 0 after BN+ReLU.
    mean = jnp.mean(h, axis=0, keepdims=True)
    var = jnp.mean((h - mean) ** 2, axis=0, keepdims=True)
    hn = (h - mean) * jax.lax.rsqrt(var + EPS)
    return jnp.maximum(hn * g + be, 0.0)


def _make_kernel(batch, in_dim, latent_dim):
    inv_n = 1.0 / float(batch * in_dim)   # MSE over the *valid* columns only

    def kernel(x_ref, w_ref, v_ref, out_ref):
        x = x_ref[...]                                        # [B, 128]

        def vec(i):                                           # [1, 128] static slice
            return v_ref[i:i + 1, :]

        # ---- encoder ----
        h = _bn_relu(_linear(x, w_ref[0], vec(0)), vec(1), vec(2))
        h = _bn_relu(_linear(h, w_ref[1], vec(3)), vec(4), vec(5))
        z = _linear(h, w_ref[2], vec(6))                      # [B,128], latent in :2

        # ---- decoder ----
        h = _bn_relu(_linear(z, w_ref[3], vec(7)), vec(8), vec(9))
        h = _bn_relu(_linear(h, w_ref[4], vec(10)), vec(11), vec(12))
        xr = _linear(h, w_ref[5], vec(13))                    # [B,128], recon in :101

        # MSELoss(x, x_recon): padded columns of both x and xr are zero, so
        # summing over all 128 lanes and dividing by B*in_dim is exact.
        diff = x - xr
        loss = jnp.sum(diff * diff) * inv_n                   # rank-0

        # Lane-dense output slab: [ x_recon | z (with loss packed in an
        # otherwise-zero lane) ] -> two unmasked 128-lane store blocks.
        lane = jax.lax.broadcasted_iota(jnp.int32, (batch, PAD), 1)
        z_slab = jnp.where(lane == latent_dim, loss, z)

        out_ref[:, 0 * PAD:1 * PAD] = xr
        out_ref[:, 1 * PAD:2 * PAD] = z_slab

    return kernel


def autoencoder_forward(x, packed_params, *, in_dim=101, latent_dim=2):
    """x: [B, in_dim] f32 -> (x_recon [B,in_dim], z [B,latent_dim], loss scalar)."""
    w_stack, v_stack = packed_params
    B = x.shape[0]

    x_pad = jnp.zeros((B, PAD), jnp.float32).at[:, :in_dim].set(x)

    out = pl.pallas_call(
        _make_kernel(B, in_dim, latent_dim),
        out_shape=jax.ShapeDtypeStruct((B, 2 * PAD), jnp.float32),
        in_specs=[pl.BlockSpec(memory_space=pltpu.MemorySpace.VMEM)] * 3,
        out_specs=pl.BlockSpec(memory_space=pltpu.MemorySpace.VMEM),
    )(x_pad, w_stack, v_stack)

    x_recon = out[:, :in_dim]
    z = out[:, PAD:PAD + latent_dim]
    loss = out[0, PAD + latent_dim]
    return x_recon, z, loss


# ------------------------------- parameters ---------------------------------

def init_params(key, in_dim=101, latent_dim=2, hidden_dim=16):
    """Synthetic init mirroring nn.Linear / nn.BatchNorm1d shapes (unpadded)."""
    lin_dims = [
        (in_dim, hidden_dim), (hidden_dim, hidden_dim), (hidden_dim, latent_dim),
        (latent_dim, hidden_dim), (hidden_dim, hidden_dim), (hidden_dim, in_dim),
    ]
    linears = []
    for fan_in, fan_out in lin_dims:
        key, kw, kb = jax.random.split(key, 3)
        bound = 1.0 / (fan_in ** 0.5)
        w = jax.random.uniform(kw, (fan_in, fan_out), jnp.float32, -bound, bound)
        b = jax.random.uniform(kb, (fan_out,), jnp.float32, -bound, bound)
        linears.append((w, b))
    # 4 BatchNorm1d layers, fresh init: gamma=1, beta=0.
    bns = [(jnp.ones((hidden_dim,), jnp.float32),
            jnp.zeros((hidden_dim,), jnp.float32)) for _ in range(4)]
    return {"linears": linears, "bns": bns}


def pack_params(raw):
    """Zero-pad every param to 128 lanes and stack into two VMEM-friendly arrays."""
    def pad_w(w):
        return jnp.zeros((PAD, PAD), jnp.float32).at[:w.shape[0], :w.shape[1]].set(w)

    def pad_v(v):
        return jnp.zeros((PAD,), jnp.float32).at[:v.shape[0]].set(v)

    (w1, b1), (w2, b2), (w3, b3), (w4, b4), (w5, b5), (w6, b6) = raw["linears"]
    (g1, be1), (g2, be2), (g4, be4), (g5, be5) = raw["bns"]

    w_stack = jnp.stack([pad_w(w) for w in (w1, w2, w3, w4, w5, w6)])      # (6,128,128)

    rows = [b1, g1, be1, b2, g2, be2, b3, b4, g4, be4, b5, g5, be5, b6]
    rows += [jnp.zeros((1,), jnp.float32)] * (16 - len(rows))              # pad to 16 rows
    v_stack = jnp.stack([pad_v(r) for r in rows])                          # (16,128)
    return w_stack, v_stack


# ------------------------------- reference -----------------------------------

def reference_forward(x, raw):
    """Pure-JAX (unpadded) reference for correctness checking."""
    (w1, b1), (w2, b2), (w3, b3), (w4, b4), (w5, b5), (w6, b6) = raw["linears"]
    (g1, be1), (g2, be2), (g4, be4), (g5, be5) = raw["bns"]

    def lin(h, w, b):
        return h @ w + b

    def bnrelu(h, g, be):
        m = h.mean(0, keepdims=True)
        v = ((h - m) ** 2).mean(0, keepdims=True)
        return jnp.maximum((h - m) / jnp.sqrt(v + EPS) * g + be, 0.0)

    h = bnrelu(lin(x, w1, b1), g1, be1)
    h = bnrelu(lin(h, w2, b2), g2, be2)
    z = lin(h, w3, b3)
    h = bnrelu(lin(z, w4, b4), g4, be4)
    h = bnrelu(lin(h, w5, b5), g5, be5)
    xr = lin(h, w6, b6)
    loss = jnp.mean((x - xr) ** 2)
    return xr, z, loss


# --------------------------------- main ---------------------------------------

if __name__ == "__main__":
    B, IN_DIM, LATENT, HIDDEN = 8, 101, 2, 16

    key = jax.random.PRNGKey(0)
    key, kx, kp = jax.random.split(key, 3)
    x = jax.random.normal(kx, (B, IN_DIM), jnp.float32)

    raw = init_params(kp, in_dim=IN_DIM, latent_dim=LATENT, hidden_dim=HIDDEN)
    packed = pack_params(raw)

    fwd = jax.jit(lambda a: autoencoder_forward(a, packed, in_dim=IN_DIM,
                                                latent_dim=LATENT))
    x_recon, z, loss = jax.block_until_ready(fwd(x))

    # Correctness check against the pure-JAX reference.
    xr_ref, z_ref_, loss_ref = reference_forward(x, raw)
    assert x_recon.shape == (B, IN_DIM) and z.shape == (B, LATENT)
    assert jnp.allclose(x_recon, xr_ref, atol=2e-3, rtol=2e-3)
    assert jnp.allclose(z, z_ref_, atol=2e-3, rtol=2e-3)
    assert jnp.allclose(loss, loss_ref, atol=2e-3, rtol=2e-3)

    # Matches the torch return signature: (x_recon, z, loss, (loss.item(), 0))
    result = (x_recon, z, loss, (float(loss), 0))

    print("KERNEL_OK")
</pallas_src>

<mosaic_0001>
module attributes {stable_mosaic.version = 11 : i64} {
  func.func @kernel(%arg0: memref<8x128xf32, #tpu.memory_space<vmem>>, %arg1: memref<6x128x128xf32, #tpu.memory_space<vmem>>, %arg2: memref<16x128xf32, #tpu.memory_space<vmem>>, %arg3: memref<8x256xf32, #tpu.memory_space<vmem>>) attributes {dimension_semantics = [], scalar_prefetch = 0 : i64, scratch_operands = 0 : i64, tpu.core_type = #tpu.core_type<tc>} {
    %c0 = arith.constant 0 : index
    %c0_0 = arith.constant 0 : index
    %0 = vector.load %arg0[%c0, %c0_0] : memref<8x128xf32, #tpu.memory_space<vmem>>, vector<8x128xf32>
    %c0_1 = arith.constant 0 : index
    %c0_2 = arith.constant 0 : index
    %c0_3 = arith.constant 0 : index
    %1 = vector.load %arg1[%c0_1, %c0_2, %c0_3] : memref<6x128x128xf32, #tpu.memory_space<vmem>>, vector<1x128x128xf32>
    %2 = vector.shape_cast %1 : vector<1x128x128xf32> to vector<128x128xf32>
    %c0_4 = arith.constant 0 : index
    %c0_5 = arith.constant 0 : index
    %3 = vector.load %arg2[%c0_4, %c0_5] : memref<16x128xf32, #tpu.memory_space<vmem>>, vector<1x128xf32>
    %cst = arith.constant dense<0.000000e+00> : vector<8x128xf32>
    %4 = tpu.matmul %0, %2, %cst {dimension_numbers = #tpu.dot_dimension_numbers<[1], [0], [0], [1], [0, 0, 1, 1], [], []>} : vector<8x128xf32>, vector<128x128xf32>, vector<8x128xf32> -> vector<8x128xf32>
    %5 = vector.broadcast %3 : vector<1x128xf32> to vector<8x128xf32>
    %6 = arith.addf %4, %5 : vector<8x128xf32>
    %c1 = arith.constant 1 : index
    %c0_6 = arith.constant 0 : index
    %7 = vector.load %arg2[%c1, %c0_6] : memref<16x128xf32, #tpu.memory_space<vmem>>, vector<1x128xf32>
    %c2 = arith.constant 2 : index
    %c0_7 = arith.constant 0 : index
    %8 = vector.load %arg2[%c2, %c0_7] : memref<16x128xf32, #tpu.memory_space<vmem>>, vector<1x128xf32>
    %cst_8 = arith.constant dense<0.000000e+00> : vector<128xf32>
    %9 = vector.multi_reduction <add>, %6, %cst_8 [0] : vector<8x128xf32> to vector<128xf32>
    %10 = vector.shape_cast %9 : vector<128xf32> to vector<1x128xf32>
    %cst_9 = arith.constant 8.000000e+00 : f32
    %11 = vector.broadcast %cst_9 : f32 to vector<1x128xf32>
    %12 = arith.divf %10, %11 : vector<1x128xf32>
    %13 = vector.broadcast %12 : vector<1x128xf32> to vector<8x128xf32>
    %14 = arith.subf %6, %13 : vector<8x128xf32>
    %15 = arith.mulf %14, %14 : vector<8x128xf32>
    %cst_10 = arith.constant dense<0.000000e+00> : vector<128xf32>
    %16 = vector.multi_reduction <add>, %15, %cst_10 [0] : vector<8x128xf32> to vector<128xf32>
    %17 = vector.shape_cast %16 : vector<128xf32> to vector<1x128xf32>
    %cst_11 = arith.constant 8.000000e+00 : f32
    %18 = vector.broadcast %cst_11 : f32 to vector<1x128xf32>
    %19 = arith.divf %17, %18 : vector<1x128xf32>
    %20 = vector.broadcast %12 : vector<1x128xf32> to vector<8x128xf32>
    %21 = arith.subf %6, %20 : vector<8x128xf32>
    %cst_12 = arith.constant 9.99999974E-6 : f32
    %22 = vector.broadcast %cst_12 : f32 to vector<1x128xf32>
    %23 = arith.addf %19, %22 : vector<1x128xf32>
    %24 = math.rsqrt %23 : vector<1x128xf32>
    %25 = vector.broadcast %24 : vector<1x128xf32> to vector<8x128xf32>
    %26 = arith.mulf %21, %25 : vector<8x128xf32>
    %27 = vector.broadcast %7 : vector<1x128xf32> to vector<8x128xf32>
    %28 = arith.mulf %26, %27 : vector<8x128xf32>
    %29 = vector.broadcast %8 : vector<1x128xf32> to vector<8x128xf32>
    %30 = arith.addf %28, %29 : vector<8x128xf32>
    %cst_13 = arith.constant 0.000000e+00 : f32
    %31 = vector.broadcast %cst_13 : f32 to vector<8x128xf32>
    %32 = arith.maximumf %30, %31 : vector<8x128xf32>
    %c1_14 = arith.constant 1 : index
    %c0_15 = arith.constant 0 : index
    %c0_16 = arith.constant 0 : index
    %33 = vector.load %arg1[%c1_14, %c0_15, %c0_16] : memref<6x128x128xf32, #tpu.memory_space<vmem>>, vector<1x128x128xf32>
    %34 = vector.shape_cast %33 : vector<1x128x128xf32> to vector<128x128xf32>
    %c3 = arith.constant 3 : index
    %c0_17 = arith.constant 0 : index
    %35 = vector.load %arg2[%c3, %c0_17] : memref<16x128xf32, #tpu.memory_space<vmem>>, vector<1x128xf32>
    %cst_18 = arith.constant dense<0.000000e+00> : vector<8x128xf32>
    %36 = tpu.matmul %32, %34, %cst_18 {dimension_numbers = #tpu.dot_dimension_numbers<[1], [0], [0], [1], [0, 0, 1, 1], [], []>} : vector<8x128xf32>, vector<128x128xf32>, vector<8x128xf32> -> vector<8x128xf32>
    %37 = vector.broadcast %35 : vector<1x128xf32> to vector<8x128xf32>
    %38 = arith.addf %36, %37 : vector<8x128xf32>
    %c4 = arith.constant 4 : index
    %c0_19 = arith.constant 0 : index
    %39 = vector.load %arg2[%c4, %c0_19] : memref<16x128xf32, #tpu.memory_space<vmem>>, vector<1x128xf32>
    %c5 = arith.constant 5 : index
    %c0_20 = arith.constant 0 : index
    %40 = vector.load %arg2[%c5, %c0_20] : memref<16x128xf32, #tpu.memory_space<vmem>>, vector<1x128xf32>
    %cst_21 = arith.constant dense<0.000000e+00> : vector<128xf32>
    %41 = vector.multi_reduction <add>, %38, %cst_21 [0] : vector<8x128xf32> to vector<128xf32>
    %42 = vector.shape_cast %41 : vector<128xf32> to vector<1x128xf32>
    %cst_22 = arith.constant 8.000000e+00 : f32
    %43 = vector.broadcast %cst_22 : f32 to vector<1x128xf32>
    %44 = arith.divf %42, %43 : vector<1x128xf32>
    %45 = vector.broadcast %44 : vector<1x128xf32> to vector<8x128xf32>
    %46 = arith.subf %38, %45 : vector<8x128xf32>
    %47 = arith.mulf %46, %46 : vector<8x128xf32>
    %cst_23 = arith.constant dense<0.000000e+00> : vector<128xf32>
    %48 = vector.multi_reduction <add>, %47, %cst_23 [0] : vector<8x128xf32> to vector<128xf32>
    %49 = vector.shape_cast %48 : vector<128xf32> to vector<1x128xf32>
    %cst_24 = arith.constant 8.000000e+00 : f32
    %50 = vector.broadcast %cst_24 : f32 to vector<1x128xf32>
    %51 = arith.divf %49, %50 : vector<1x128xf32>
    %52 = vector.broadcast %44 : vector<1x128xf32> to vector<8x128xf32>
    %53 = arith.subf %38, %52 : vector<8x128xf32>
    %cst_25 = arith.constant 9.99999974E-6 : f32
    %54 = vector.broadcast %cst_25 : f32 to vector<1x128xf32>
    %55 = arith.addf %51, %54 : vector<1x128xf32>
    %56 = math.rsqrt %55 : vector<1x128xf32>
    %57 = vector.broadcast %56 : vector<1x128xf32> to vector<8x128xf32>
    %58 = arith.mulf %53, %57 : vector<8x128xf32>
    %59 = vector.broadcast %39 : vector<1x128xf32> to vector<8x128xf32>
    %60 = arith.mulf %58, %59 : vector<8x128xf32>
    %61 = vector.broadcast %40 : vector<1x128xf32> to vector<8x128xf32>
    %62 = arith.addf %60, %61 : vector<8x128xf32>
    %cst_26 = arith.constant 0.000000e+00 : f32
    %63 = vector.broadcast %cst_26 : f32 to vector<8x128xf32>
    %64 = arith.maximumf %62, %63 : vector<8x128xf32>
    %c2_27 = arith.constant 2 : index
    %c0_28 = arith.constant 0 : index
    %c0_29 = arith.constant 0 : index
    %65 = vector.load %arg1[%c2_27, %c0_28, %c0_29] : memref<6x128x128xf32, #tpu.memory_space<vmem>>, vector<1x128x128xf32>
    %66 = vector.shape_cast %65 : vector<1x128x128xf32> to vector<128x128xf32>
    %c6 = arith.constant 6 : index
    %c0_30 = arith.constant 0 : index
    %67 = vector.load %arg2[%c6, %c0_30] : memref<16x128xf32, #tpu.memory_space<vmem>>, vector<1x128xf32>
    %cst_31 = arith.constant dense<0.000000e+00> : vector<8x128xf32>
    %68 = tpu.matmul %64, %66, %cst_31 {dimension_numbers = #tpu.dot_dimension_numbers<[1], [0], [0], [1], [0, 0, 1, 1], [], []>} : vector<8x128xf32>, vector<128x128xf32>, vector<8x128xf32> -> vector<8x128xf32>
    %69 = vector.broadcast %67 : vector<1x128xf32> to vector<8x128xf32>
    %70 = arith.addf %68, %69 : vector<8x128xf32>
    %c3_32 = arith.constant 3 : index
    %c0_33 = arith.constant 0 : index
    %c0_34 = arith.constant 0 : index
    %71 = vector.load %arg1[%c3_32, %c0_33, %c0_34] : memref<6x128x128xf32, #tpu.memory_space<vmem>>, vector<1x128x128xf32>
    %72 = vector.shape_cast %71 : vector<1x128x128xf32> to vector<128x128xf32>
    %c7 = arith.constant 7 : index
    %c0_35 = arith.constant 0 : index
    %73 = vector.load %arg2[%c7, %c0_35] : memref<16x128xf32, #tpu.memory_space<vmem>>, vector<1x128xf32>
    %cst_36 = arith.constant dense<0.000000e+00> : vector<8x128xf32>
    %74 = tpu.matmul %70, %72, %cst_36 {dimension_numbers = #tpu.dot_dimension_numbers<[1], [0], [0], [1], [0, 0, 1, 1], [], []>} : vector<8x128xf32>, vector<128x128xf32>, vector<8x128xf32> -> vector<8x128xf32>
    %75 = vector.broadcast %73 : vector<1x128xf32> to vector<8x128xf32>
    %76 = arith.addf %74, %75 : vector<8x128xf32>
    %c8 = arith.constant 8 : index
    %c0_37 = arith.constant 0 : index
    %77 = vector.load %arg2[%c8, %c0_37] : memref<16x128xf32, #tpu.memory_space<vmem>>, vector<1x128xf32>
    %c9 = arith.constant 9 : index
    %c0_38 = arith.constant 0 : index
    %78 = vector.load %arg2[%c9, %c0_38] : memref<16x128xf32, #tpu.memory_space<vmem>>, vector<1x128xf32>
    %cst_39 = arith.constant dense<0.000000e+00> : vector<128xf32>
    %79 = vector.multi_reduction <add>, %76, %cst_39 [0] : vector<8x128xf32> to vector<128xf32>
    %80 = vector.shape_cast %79 : vector<128xf32> to vector<1x128xf32>
    %cst_40 = arith.constant 8.000000e+00 : f32
    %81 = vector.broadcast %cst_40 : f32 to vector<1x128xf32>
    %82 = arith.divf %80, %81 : vector<1x128xf32>
    %83 = vector.broadcast %82 : vector<1x128xf32> to vector<8x128xf32>
    %84 = arith.subf %76, %83 : vector<8x128xf32>
    %85 = arith.mulf %84, %84 : vector<8x128xf32>
    %cst_41 = arith.constant dense<0.000000e+00> : vector<128xf32>
    %86 = vector.multi_reduction <add>, %85, %cst_41 [0] : vector<8x128xf32> to vector<128xf32>
    %87 = vector.shape_cast %86 : vector<128xf32> to vector<1x128xf32>
    %cst_42 = arith.constant 8.000000e+00 : f32
    %88 = vector.broadcast %cst_42 : f32 to vector<1x128xf32>
    %89 = arith.divf %87, %88 : vector<1x128xf32>
    %90 = vector.broadcast %82 : vector<1x128xf32> to vector<8x128xf32>
    %91 = arith.subf %76, %90 : vector<8x128xf32>
    %cst_43 = arith.constant 9.99999974E-6 : f32
    %92 = vector.broadcast %cst_43 : f32 to vector<1x128xf32>
    %93 = arith.addf %89, %92 : vector<1x128xf32>
    %94 = math.rsqrt %93 : vector<1x128xf32>
    %95 = vector.broadcast %94 : vector<1x128xf32> to vector<8x128xf32>
    %96 = arith.mulf %91, %95 : vector<8x128xf32>
    %97 = vector.broadcast %77 : vector<1x128xf32> to vector<8x128xf32>
    %98 = arith.mulf %96, %97 : vector<8x128xf32>
    %99 = vector.broadcast %78 : vector<1x128xf32> to vector<8x128xf32>
    %100 = arith.addf %98, %99 : vector<8x128xf32>
    %cst_44 = arith.constant 0.000000e+00 : f32
    %101 = vector.broadcast %cst_44 : f32 to vector<8x128xf32>
    %102 = arith.maximumf %100, %101 : vector<8x128xf32>
    %c4_45 = arith.constant 4 : index
    %c0_46 = arith.constant 0 : index
    %c0_47 = arith.constant 0 : index
    %103 = vector.load %arg1[%c4_45, %c0_46, %c0_47] : memref<6x128x128xf32, #tpu.memory_space<vmem>>, vector<1x128x128xf32>
    %104 = vector.shape_cast %103 : vector<1x128x128xf32> to vector<128x128xf32>
    %c10 = arith.constant 10 : index
    %c0_48 = arith.constant 0 : index
    %105 = vector.load %arg2[%c10, %c0_48] : memref<16x128xf32, #tpu.memory_space<vmem>>, vector<1x128xf32>
    %cst_49 = arith.constant dense<0.000000e+00> : vector<8x128xf32>
    %106 = tpu.matmul %102, %104, %cst_49 {dimension_numbers = #tpu.dot_dimension_numbers<[1], [0], [0], [1], [0, 0, 1, 1], [], []>} : vector<8x128xf32>, vector<128x128xf32>, vector<8x128xf32> -> vector<8x128xf32>
    %107 = vector.broadcast %105 : vector<1x128xf32> to vector<8x128xf32>
    %108 = arith.addf %106, %107 : vector<8x128xf32>
    %c11 = arith.constant 11 : index
    %c0_50 = arith.constant 0 : index
    %109 = vector.load %arg2[%c11, %c0_50] : memref<16x128xf32, #tpu.memory_space<vmem>>, vector<1x128xf32>
    %c12 = arith.constant 12 : index
    %c0_51 = arith.constant 0 : index
    %110 = vector.load %arg2[%c12, %c0_51] : memref<16x128xf32, #tpu.memory_space<vmem>>, vector<1x128xf32>
    %cst_52 = arith.constant dense<0.000000e+00> : vector<128xf32>
    %111 = vector.multi_reduction <add>, %108, %cst_52 [0] : vector<8x128xf32> to vector<128xf32>
    %112 = vector.shape_cast %111 : vector<128xf32> to vector<1x128xf32>
    %cst_53 = arith.constant 8.000000e+00 : f32
    %113 = vector.broadcast %cst_53 : f32 to vector<1x128xf32>
    %114 = arith.divf %112, %113 : vector<1x128xf32>
    %115 = vector.broadcast %114 : vector<1x128xf32> to vector<8x128xf32>
    %116 = arith.subf %108, %115 : vector<8x128xf32>
    %117 = arith.mulf %116, %116 : vector<8x128xf32>
    %cst_54 = arith.constant dense<0.000000e+00> : vector<128xf32>
    %118 = vector.multi_reduction <add>, %117, %cst_54 [0] : vector<8x128xf32> to vector<128xf32>
    %119 = vector.shape_cast %118 : vector<128xf32> to vector<1x128xf32>
    %cst_55 = arith.constant 8.000000e+00 : f32
    %120 = vector.broadcast %cst_55 : f32 to vector<1x128xf32>
    %121 = arith.divf %119, %120 : vector<1x128xf32>
    %122 = vector.broadcast %114 : vector<1x128xf32> to vector<8x128xf32>
    %123 = arith.subf %108, %122 : vector<8x128xf32>
    %cst_56 = arith.constant 9.99999974E-6 : f32
    %124 = vector.broadcast %cst_56 : f32 to vector<1x128xf32>
    %125 = arith.addf %121, %124 : vector<1x128xf32>
    %126 = math.rsqrt %125 : vector<1x128xf32>
    %127 = vector.broadcast %126 : vector<1x128xf32> to vector<8x128xf32>
    %128 = arith.mulf %123, %127 : vector<8x128xf32>
    %129 = vector.broadcast %109 : vector<1x128xf32> to vector<8x128xf32>
    %130 = arith.mulf %128, %129 : vector<8x128xf32>
    %131 = vector.broadcast %110 : vector<1x128xf32> to vector<8x128xf32>
    %132 = arith.addf %130, %131 : vector<8x128xf32>
    %cst_57 = arith.constant 0.000000e+00 : f32
    %133 = vector.broadcast %cst_57 : f32 to vector<8x128xf32>
    %134 = arith.maximumf %132, %133 : vector<8x128xf32>
    %c5_58 = arith.constant 5 : index
    %c0_59 = arith.constant 0 : index
    %c0_60 = arith.constant 0 : index
    %135 = vector.load %arg1[%c5_58, %c0_59, %c0_60] : memref<6x128x128xf32, #tpu.memory_space<vmem>>, vector<1x128x128xf32>
    %136 = vector.shape_cast %135 : vector<1x128x128xf32> to vector<128x128xf32>
    %c13 = arith.constant 13 : index
    %c0_61 = arith.constant 0 : index
    %137 = vector.load %arg2[%c13, %c0_61] : memref<16x128xf32, #tpu.memory_space<vmem>>, vector<1x128xf32>
    %cst_62 = arith.constant dense<0.000000e+00> : vector<8x128xf32>
    %138 = tpu.matmul %134, %136, %cst_62 {dimension_numbers = #tpu.dot_dimension_numbers<[1], [0], [0], [1], [0, 0, 1, 1], [], []>} : vector<8x128xf32>, vector<128x128xf32>, vector<8x128xf32> -> vector<8x128xf32>
    %139 = vector.broadcast %137 : vector<1x128xf32> to vector<8x128xf32>
    %140 = arith.addf %138, %139 : vector<8x128xf32>
    %141 = arith.subf %0, %140 : vector<8x128xf32>
    %142 = arith.mulf %141, %141 : vector<8x128xf32>
    %143 = vector.shape_cast %142 : vector<8x128xf32> to vector<1x8x128xf32>
    %cst_63 = arith.constant dense<0.000000e+00> : vector<1xf32>
    %144 = vector.multi_reduction <add>, %143, %cst_63 [1, 2] : vector<1x8x128xf32> to vector<1xf32>
    %145 = vector.shape_cast %144 : vector<1xf32> to vector<1x1x1xf32>
    %146 = vector.extract %145[0, 0, 0] : f32 from vector<1x1x1xf32>
    %cst_64 = arith.constant 0.00123762374 : f32
    %147 = arith.mulf %146, %cst_64 : f32
    %148 = tpu.iota {dimensions = array<i32: 1>} : vector<8x128xi32>
    %c2_i32 = arith.constant 2 : i32
    %149 = vector.broadcast %c2_i32 : i32 to vector<8x128xi32>
    %150 = arith.cmpi eq, %148, %149 : vector<8x128xi32>
    %151 = vector.broadcast %147 : f32 to vector<8x128xf32>
    %152 = arith.select %150, %151, %70 : vector<8x128xi1>, vector<8x128xf32>
    %c0_65 = arith.constant 0 : index
    %c0_66 = arith.constant 0 : index
    %153 = vector.load %arg3[%c0_65, %c0_66] : memref<8x256xf32, #tpu.memory_space<vmem>>, vector<8x128xf32>
    tpu.vector_store %arg3[%c0_65, %c0_66], %140 {strides = array<i32>} : memref<8x256xf32, #tpu.memory_space<vmem>>, vector<8x128xf32>,
    %c0_67 = arith.constant 0 : index
    %c128 = arith.constant 128 : index
    %154 = vector.load %arg3[%c0_67, %c128] : memref<8x256xf32, #tpu.memory_space<vmem>>, vector<8x128xf32>
    tpu.vector_store %arg3[%c0_67, %c128], %152 {strides = array<i32>} : memref<8x256xf32, #tpu.memory_space<vmem>>, vector<8x128xf32>,
    return
  }
}

</mosaic_0001>

<bundles_post_ra>
// kernel: _lambda_.1
= control target key start
LH: loop header
LB: loop body
LE: loop exit
PB: predicated region body
PF: predicated region fallthrough
CT: control target
= control target key end

     0   :  { %8 = vsyncpa [#allocation3], 0  ;;  %s491_s15 = smov [#allocation2]   ;;  %s492_s17 = smov 128   ;;  %s587_s0 = inlined_call_operand.vmem [shape: f32[8,128], index: 0, kind: input, shape index: {}]   ;;  %s588_s1 = inlined_call_operand.hbm [shape: f32[6,128,128], index: 1, kind: input, shape index: {}]   ;;  %s589_s2 = inlined_call_operand.vmem [shape: f32[16,128], index: 2, kind: input, shape index: {}]   ;;  %s590_s3 = inlined_call_operand.vmem [shape: f32[8,256], index: 3, kind: output, shape index: {}]  }
   0x1   :  { %s15_s14 = sshll.u32 %s588_s1, 4  ;;  %s17_s16 = sshll.u32 %s491_s15, 4  ;;  %s16_s14 = int_to_ptr.hbm [resolvable:$true] %s15_s14  ;;  %s18_s16 = int_to_ptr.vmem [resolvable:$true] %s17_s16 }
   0x2   :  { %s493_s18 = smov 8  }
   0x3   :  { %23 = dma.hbm_to_vmem [thread:$0]  %s16_s14, 12288, %s18_s16, [#allocation3], %s492_s17, %s492_s17, %s493_s18  }
   0x4   :  { %489 = dma.done.wait [#allocation3], 12288  }
   0x5   :  { %490 = vsyncadd [#allocation3], 4294955008  ;;  %v46_v0 = vld [vmem:[#allocation2 + $0x78] sm:$0xff]  ;;  %v45_v1 = vld [vmem:[#allocation2 + $0x70] sm:$0xff]  ;;  %v494_v17 = vmov 8.0  }
   0x6   :  { %49 = vmatpush.msra.mxu0 %v46_v0  ;;  %v44_v2 = vld [vmem:[#allocation2 + $0x68] sm:$0xff]  ;;  %v43_v3 = vld [vmem:[#allocation2 + $0x60] sm:$0xff]  ;;  %v42_v4 = vld [vmem:[#allocation2 + $0x58] sm:$0xff]  ;;  %455 = vrcp.f32 %v494_v17 }
   0x7   :  { %v41_v5 = vld [vmem:[#allocation2 + $0x50] sm:$0xff]  ;;  %v40_v6 = vld [vmem:[#allocation2 + $0x48] sm:$0xff]  ;;  %v39_v7 = vld [vmem:[#allocation2 + $0x40] sm:$0xff] }
   0x8   :  { %50 = vmatpush.msra.mxu0 %v45_v1  ;;  %v38_v8 = vld [vmem:[#allocation2 + $0x38] sm:$0xff]  ;;  %v37_v9 = vld [vmem:[#allocation2 + $0x30] sm:$0xff]  ;;  %v36_v10 = vld [vmem:[#allocation2 + $0x28] sm:$0xff] }
   0x9   :  { %v35_v11 = vld [vmem:[#allocation2 + $0x20] sm:$0xff]  ;;  %v34_v12 = vld [vmem:[#allocation2 + $0x18] sm:$0xff]  ;;  %v33_v13 = vld [vmem:[#allocation2 + $0x10] sm:$0xff] }
   0xa   :  { %51 = vmatpush.msra.mxu0 %v44_v2  ;;  %v32_v14 = vld [vmem:[#allocation2 + $0x8] sm:$0xff]  ;;  %v31_v15 = vld [vmem:[#allocation2] sm:$0xff]  ;;  %v127_v21 = vld [vmem:[#allocation2 + $0xf8] sm:$0xff] }
   0xb   :  { %v521_v16 = vld [vmem:[%s587_s0] sm:$0xff]  ;;  %130 = vmatpush.msra.mxu1 %v127_v21  ;;  %v126_v25 = vld [vmem:[#allocation2 + $0xf0] sm:$0xff]  ;;  %v125_v26 = vld [vmem:[#allocation2 + $0xe8] sm:$0xff] }
   0xc   :  { %52 = vmatpush.msra.mxu0 %v43_v3  ;;  %v456_v18 = vpop.eup %455  ;;  %v441_v20 = vld [vmem:[%s589_s2] ss:$0 sm:$0xff]  ;;  %v123_v31 = vld [vmem:[#allocation2 + $0xd8] sm:$0xff]  ;;  %v122_v33 = vld [vmem:[#allocation2 + $0xd0] sm:$0xff] }
   0xd   :  { %v78_v19 = vmul.f32 8.0, %v456_v18  ;;  %131 = vmatpush.msra.mxu1 %v126_v25  ;;  %v124_v28 = vld [vmem:[#allocation2 + $0xe0] sm:$0xff]  ;;  %vm82_vm0 = vweird.f32 %v456_v18  ;;  %v121_v36 = vld [vmem:[#allocation2 + $0xc8] sm:$0xff]  ;;  %v119_v41 = vld [vmem:[#allocation2 + $0xb8] sm:$0xff] }
   0xe   :  { %53 = vmatpush.msra.mxu0 %v42_v4  ;;  %v120_v38 = vld [vmem:[#allocation2 + $0xc0] sm:$0xff]  ;;  %v118_v43 = vld [vmem:[#allocation2 + $0xb0] sm:$0xff]  ;;  %v117_v45 = vld [vmem:[#allocation2 + $0xa8] sm:$0xff] }
   0xf   :  { %v79_v23 = vsub.f32 1.0, %v78_v19  ;;  %132 = vmatpush.msra.mxu1 %v125_v26  ;;  %v116_v47 = vld [vmem:[#allocation2 + $0xa0] sm:$0xff]  ;;  %v115_v49 = vld [vmem:[#allocation2 + $0x98] sm:$0xff]  ;;  %v114_v51 = vld [vmem:[#allocation2 + $0x90] sm:$0xff] }
  0x10   :  { %54 = vmatpush.msra.mxu0 %v41_v5  ;;  %v113_v53 = vld [vmem:[#allocation2 + $0x88] sm:$0xff]  ;;  %v112_v55 = vld [vmem:[#allocation2 + $0x80] sm:$0xff]  ;;  %v197_v19 = vld [vmem:[#allocation2 + $0x158] sm:$0xff] }
  0x11   :  { %v80_v29 = vmul.f32 %v456_v18, %v79_v23  ;;  %133 = vmatpush.msra.mxu1 %v124_v28  ;;  %v442_v2 = vld [vmem:[%s589_s2 + $0x1] ss:$0 sm:$0xff]  ;;  %v443_v5 = vld [vmem:[%s589_s2 + $0x2] ss:$0 sm:$0xff]  ;;  %v196_v21 = vld [vmem:[#allocation2 + $0x150] sm:$0xff] }
  0x12   :  { %55 = vmatpush.msra.mxu0 %v40_v6  ;;  %v198_v17 = vld [vmem:[#allocation2 + $0x160] sm:$0xff]  ;;  %v195_v23 = vld [vmem:[#allocation2 + $0x148] sm:$0xff] }
  0x13   :  { %v81_v34 = vadd.f32 %v456_v18, %v80_v29  ;;  %134 = vmatpush.msra.mxu1 %v123_v31  ;;  %v194_v25 = vld [vmem:[#allocation2 + $0x140] sm:$0xff]  ;;  %v192_v29 = vld [vmem:[#allocation2 + $0x130] sm:$0xff]  ;;  %v191_v31 = vld [vmem:[#allocation2 + $0x128] sm:$0xff] }
  0x14   :  { %56 = vmatpush.msra.mxu0 %v39_v7 }
  0x15   :  { %135 = vmatpush.msra.mxu1 %v122_v33  ;;  %v527_v39 = vsel %vm82_vm0, %v456_v18, %v81_v34  ;;  %v190_v33 = vld [vmem:[#allocation2 + $0x120] sm:$0xff] }
  0x16   :  { %57 = vmatpush.msra.mxu0 %v38_v8 }
  0x17   :  { %136 = vmatpush.msra.mxu1 %v121_v36 }
  0x18   :  { %58 = vmatpush.msra.mxu0 %v37_v9  ;;  %v444_v9 = vld [vmem:[%s589_s2 + $0x3] ss:$0 sm:$0xff] }
  0x19   :  { %137 = vmatpush.msra.mxu1 %v120_v38 }
  0x1a   :  { %59 = vmatpush.msra.mxu0 %v36_v10  ;;  %v201_v10 = vld [vmem:[#allocation2 + $0x178] sm:$0xff] }
  0x1b   :  { %138 = vmatpush.msra.mxu1 %v119_v41  ;;  %204 = vmatpush.msra.mxu2 %v201_v10  ;;  %v226_v10 = vld [vmem:[#allocation2 + $0x188] sm:$0xff] }
  0x1c   :  { %60 = vmatpush.msra.mxu0 %v35_v11 }
  0x1d   :  { %139 = vmatpush.msra.mxu1 %v118_v43 }
  0x1e   :  { %61 = vmatpush.msra.mxu0 %v34_v12 }
  0x1f   :  { %140 = vmatpush.msra.mxu1 %v117_v45  ;;  %v240_v45 = vld [vmem:[#allocation2 + $0x1f8] sm:$0xff] }
  0x20   :  { %62 = vmatpush.msra.mxu0 %v33_v13  ;;  %v200_v13 = vld [vmem:[#allocation2 + $0x170] sm:$0xff]  ;;  %243 = vmatpush.msra.mxu3 %v240_v45 }
  0x21   :  { %141 = vmatpush.msra.mxu1 %v116_v47  ;;  %205 = vmatpush.msra.mxu2 %v200_v13 }
  0x22   :  { %63 = vmatpush.msra.mxu0 %v32_v14  ;;  %v199_v14 = vld [vmem:[#allocation2 + $0x168] sm:$0xff] }
  0x23   :  { %142 = vmatpush.msra.mxu1 %v115_v49  ;;  %206 = vmatpush.msra.mxu2 %v199_v14 }
  0x24   :  { %64 = vmatpush.msra.mxu0 %v31_v15 }
  0x25   :  { %65 = vmatmul.f32.vlgmr.msra.gmra.mxu0 %v521_v16  ;;  %143 = vmatpush.msra.mxu1 %v114_v51  ;;  %v236_v51 = vld [vmem:[#allocation2 + $0x1d8] sm:$0xff] }
  0x26   :  { %207 = vmatpush.msra.mxu2 %v198_v17  ;;  %v314_v17 = vld [vmem:[#allocation2 + $0x278] sm:$0xff] }
  0x27   :  { %144 = vmatpush.msra.mxu1 %v113_v53  ;;  %v234_v53 = vld [vmem:[#allocation2 + $0x1c8] sm:$0xff]  ;;  %317 = vmatpush.msrb.mxu0 %v314_v17 }
  0x28   :  { %208 = vmatpush.msra.mxu2 %v197_v19 }
  0x29   :  { %145 = vmatpush.msra.mxu1 %v112_v55  ;;  %v233_v55 = vld [vmem:[#allocation2 + $0x1c0] sm:$0xff] }
  0x2a   :  { %209 = vmatpush.msra.mxu2 %v196_v21 }
  0x2c   :  { %210 = vmatpush.msra.mxu2 %v195_v23 }
  0x2e   :  { %211 = vmatpush.msra.mxu2 %v194_v25 }
  0xa2   :  { %v66_v22 = vpop.f32.mrf.mxu0 }
  0xa3   :  { %v67_v24 = vadd.f32 %v441_v20, %v66_v22 }
  0xa5   :  { %v71_v27 = vrot.slane %v67_v24, 4 }
  0xa7   :  { %v72_v30 = vadd.f32 %v71_v27, %v67_v24  ;;  %v193_v27 = vld [vmem:[#allocation2 + $0x138] sm:$0xff] }
  0xa8   :  { %212 = vmatpush.msra.mxu2 %v193_v27 }
  0xa9   :  { %v73_v32 = vrot.slane %v72_v30, 2 }
  0xaa   :  { %213 = vmatpush.msra.mxu2 %v192_v29 }
  0xab   :  { %v74_v35 = vadd.f32 %v73_v32, %v72_v30 }
  0xac   :  { %214 = vmatpush.msra.mxu2 %v191_v31 }
  0xad   :  { %v75_v37 = vrot.slane %v74_v35, 1 }
  0xae   :  { %215 = vmatpush.msra.mxu2 %v190_v33 }
  0xaf   :  { %v76_v40 = vadd.f32 %v75_v37, %v74_v35  ;;  %v189_v35 = vld [vmem:[#allocation2 + $0x118] sm:$0xff]  ;;  %v188_v37 = vld [vmem:[#allocation2 + $0x110] sm:$0xff] }
  0xb0   :  { %216 = vmatpush.msra.mxu2 %v189_v35 }
  0xb1   :  { %v84_v42 = vmul.f32 %v527_v39, %v76_v40  ;;  %v187_v40 = vld [vmem:[#allocation2 + $0x108] sm:$0xff] }
  0xb2   :  { %217 = vmatpush.msra.mxu2 %v188_v37 }
  0xb3   :  { %v85_v44 = vsub.f32 %v67_v24, %v84_v42  ;;  %v186_v42 = vld [vmem:[#allocation2 + $0x100] sm:$0xff] }
  0xb4   :  { %218 = vmatpush.msra.mxu2 %v187_v40 }
  0xb5   :  { %v86_v46 = vmul.f32 %v85_v44, %v85_v44 }
  0xb6   :  { %219 = vmatpush.msra.mxu2 %v186_v42 }
  0xb7   :  { %v87_v48 = vrot.slane %v86_v46, 4 }
  0xb9   :  { %v88_v50 = vadd.f32 %v87_v48, %v86_v46  ;;  %v239_v46 = vld [vmem:[#allocation2 + $0x1f0] sm:$0xff]  ;;  %v238_v48 = vld [vmem:[#allocation2 + $0x1e8] sm:$0xff] }
  0xba   :  { %244 = vmatpush.msra.mxu3 %v239_v46  ;;  %v300_v46 = vld [vmem:[#allocation2 + $0x208] sm:$0xff] }
  0xbb   :  { %v89_v52 = vrot.slane %v88_v50, 2 }
  0xbc   :  { %245 = vmatpush.msra.mxu3 %v238_v48  ;;  %v299_v48 = vld [vmem:[#allocation2 + $0x200] sm:$0xff] }
  0xbd   :  { %v90_v54 = vadd.f32 %v89_v52, %v88_v50  ;;  %v237_v50 = vld [vmem:[#allocation2 + $0x1e0] sm:$0xff]  ;;  %v235_v52 = vld [vmem:[#allocation2 + $0x1d0] sm:$0xff] }
  0xbe   :  { %246 = vmatpush.msra.mxu3 %v237_v50 }
  0xbf   :  { %v91_v56 = vrot.slane %v90_v54, 1 }
  0xc0   :  { %247 = vmatpush.msra.mxu3 %v236_v51 }
  0xc1   :  { %v92_v57 = vadd.f32 %v91_v56, %v90_v54 }
  0xc2   :  { %248 = vmatpush.msra.mxu3 %v235_v52 }
  0xc3   :  { %v93_v58 = vmul.f32 %v92_v57, %v527_v39  ;;  %v232_v57 = vld [vmem:[#allocation2 + $0x1b8] sm:$0xff] }
  0xc4   :  { %249 = vmatpush.msra.mxu3 %v234_v53 }
  0xc5   :  { %v94_v59 = vadd.f32 1e-05, %v93_v58 }
  0xc6   :  { %250 = vmatpush.msra.mxu3 %v233_v55 }
  0xc7   :  { %457 = vrsqrt.f32 %v94_v59  ;;  %vm101_vm2 = vweird.f32 %v94_v59 }
  0xc8   :  { %251 = vmatpush.msra.mxu3 %v232_v57 }
  0xcd   :  { %v458_v60 = vpop.eup %457 }
  0xce   :  { %v96_v61 = vmul.f32 %v458_v60, %v94_v59  ;;  %vm102_vm1 = vweird.f32 %v458_v60  ;;  %v231_v59 = vld [vmem:[#allocation2 + $0x1b0] sm:$0xff] }
  0xcf   :  { %vm103_vm3 = vmor %vm101_vm2, %vm102_vm1  ;;  %252 = vmatpush.msra.mxu3 %v231_v59  ;;  %v449_v59 = vld [vmem:[%s589_s2 + $0x8] ss:$0 sm:$0xff] }
  0xd0   :  { %v97_v62 = vmul.f32 %v458_v60, %v96_v61  ;;  %v230_v61 = vld [vmem:[#allocation2 + $0x1a8] sm:$0xff] }
  0xd1   :  { %253 = vmatpush.msra.mxu3 %v230_v61 }
  0xd2   :  { %v98_v63 = vmul.f32 0.5, %v97_v62 }
  0xd4   :  { %v99_v0 = vsub.f32 1.5, %v98_v63  ;;  %v229_v63 = vld [vmem:[#allocation2 + $0x1a0] sm:$0xff] }
  0xd5   :  { %254 = vmatpush.msra.mxu3 %v229_v63 }
  0xd6   :  { %v100_v1 = vmul.f32 %v458_v60, %v99_v0 }
  0xd8   :  { %v104_v3 = vsel %vm103_vm3, %v458_v60, %v100_v1  ;;  %v445_v1 = vld [vmem:[%s589_s2 + $0x4] ss:$0 sm:$0xff] }
  0xd9   :  { %v105_v4 = vmul.f32 %v104_v3, %v85_v44 }
  0xdb   :  { %v107_v6 = vmul.f32 %v442_v2, %v105_v4  ;;  %v228_v2 = vld [vmem:[#allocation2 + $0x198] sm:$0xff] }
  0xdc   :  { %255 = vmatpush.msra.mxu3 %v228_v2  ;;  %v451_v2 = vld [vmem:[%s589_s2 + $0xa] ss:$0 sm:$0xff] }
  0xdd   :  { %v109_v7 = vadd.f32 %v443_v5, %v107_v6  ;;  %v446_v5 = vld [vmem:[%s589_s2 + $0x5] ss:$0 sm:$0xff]  ;;  %v227_v6 = vld [vmem:[#allocation2 + $0x190] sm:$0xff] }
  0xde   :  { %256 = vmatpush.msra.mxu3 %v227_v6  ;;  %v387_v6 = vld [vmem:[#allocation2 + $0x2f0] sm:$0xff] }
  0xdf   :  { %v110_v8 = vmax.f32 %v109_v7, 0.0 }
  0xe0   :  { %257 = vmatpush.msra.mxu3 %v226_v10  ;;  %v385_v10 = vld [vmem:[#allocation2 + $0x2e0] sm:$0xff] }
  0xe1   :  { %146 = vmatmul.f32.vlgmr.msra.gmra.mxu1 %v110_v8 }
 0x15e   :  { %v147_v11 = vpop.f32.mrf.mxu1 }
 0x15f   :  { %v148_v12 = vadd.f32 %v444_v9, %v147_v11  ;;  %v225_v11 = vld [vmem:[#allocation2 + $0x180] sm:$0xff] }
 0x160   :  { %258 = vmatpush.msra.mxu3 %v225_v11 }
 0x161   :  { %v152_v15 = vrot.slane %v148_v12, 4 }
 0x163   :  { %v153_v18 = vadd.f32 %v152_v15, %v148_v12  ;;  %v448_v15 = vld [vmem:[%s589_s2 + $0x7] ss:$0 sm:$0xff] }
 0x165   :  { %v154_v20 = vrot.slane %v153_v18, 2 }
 0x167   :  { %v155_v22 = vadd.f32 %v154_v20, %v153_v18  ;;  %v313_v20 = vld [vmem:[#allocation2 + $0x270] sm:$0xff] }
 0x168   :  { %318 = vmatpush.msrb.mxu0 %v313_v20  ;;  %v381_v20 = vld [vmem:[#allocation2 + $0x2c0] sm:$0xff] }
 0x169   :  { %v156_v24 = vrot.slane %v155_v22, 1 }
 0x16b   :  { %v157_v26 = vadd.f32 %v156_v24, %v155_v22  ;;  %v312_v22 = vld [vmem:[#allocation2 + $0x268] sm:$0xff]  ;;  %v311_v24 = vld [vmem:[#allocation2 + $0x260] sm:$0xff] }
 0x16c   :  { %319 = vmatpush.msrb.mxu0 %v312_v22  ;;  %v380_v22 = vld [vmem:[#allocation2 + $0x2b8] sm:$0xff] }
 0x16d   :  { %v158_v28 = vmul.f32 %v157_v26, %v527_v39  ;;  %v310_v26 = vld [vmem:[#allocation2 + $0x258] sm:$0xff] }
 0x16e   :  { %320 = vmatpush.msrb.mxu0 %v311_v24  ;;  %v379_v24 = vld [vmem:[#allocation2 + $0x2b0] sm:$0xff] }
 0x16f   :  { %v159_v30 = vsub.f32 %v148_v12, %v158_v28  ;;  %v447_v12 = vld [vmem:[%s589_s2 + $0x6] ss:$0 sm:$0xff]  ;;  %v309_v28 = vld [vmem:[#allocation2 + $0x250] sm:$0xff] }
 0x170   :  { %321 = vmatpush.msrb.mxu0 %v310_v26  ;;  %v378_v26 = vld [vmem:[#allocation2 + $0x2a8] sm:$0xff] }
 0x171   :  { %v160_v32 = vmul.f32 %v159_v30, %v159_v30 }
 0x172   :  { %322 = vmatpush.msrb.mxu0 %v309_v28  ;;  %v377_v28 = vld [vmem:[#allocation2 + $0x2a0] sm:$0xff] }
 0x173   :  { %v161_v34 = vrot.slane %v160_v32, 4 }
 0x175   :  { %v162_v36 = vadd.f32 %v161_v34, %v160_v32  ;;  %v307_v32 = vld [vmem:[#allocation2 + $0x240] sm:$0xff]  ;;  %v306_v34 = vld [vmem:[#allocation2 + $0x238] sm:$0xff] }
 0x177   :  { %v163_v38 = vrot.slane %v162_v36, 2 }
 0x179   :  { %v164_v41 = vadd.f32 %v163_v38, %v162_v36  ;;  %v305_v36 = vld [vmem:[#allocation2 + $0x230] sm:$0xff]  ;;  %v304_v38 = vld [vmem:[#allocation2 + $0x228] sm:$0xff] }
 0x17b   :  { %v165_v43 = vrot.slane %v164_v41, 1 }
 0x17d   :  { %v166_v44 = vadd.f32 %v165_v43, %v164_v41  ;;  %v303_v41 = vld [vmem:[#allocation2 + $0x220] sm:$0xff]  ;;  %v302_v43 = vld [vmem:[#allocation2 + $0x218] sm:$0xff] }
 0x17f   :  { %v167_v47 = vmul.f32 %v166_v44, %v527_v39  ;;  %v301_v44 = vld [vmem:[#allocation2 + $0x210] sm:$0xff] }
 0x181   :  { %v168_v49 = vadd.f32 1e-05, %v167_v47 }
 0x183   :  { %459 = vrsqrt.f32 %v168_v49  ;;  %vm175_vm5 = vweird.f32 %v168_v49 }
 0x189   :  { %v460_v54 = vpop.eup %459 }
 0x18a   :  { %v170_v56 = vmul.f32 %v460_v54, %v168_v49  ;;  %vm176_vm4 = vweird.f32 %v460_v54 }
 0x18b   :  { %vm177_vm6 = vmor %vm175_vm5, %vm176_vm4 }
 0x18c   :  { %v171_v58 = vmul.f32 %v460_v54, %v170_v56 }
 0x18e   :  { %v172_v60 = vmul.f32 0.5, %v171_v58 }
 0x190   :  { %v173_v62 = vsub.f32 1.5, %v172_v60 }
 0x192   :  { %v174_v0 = vmul.f32 %v460_v54, %v173_v62  ;;  %v450_v62 = vld [vmem:[%s589_s2 + $0x9] ss:$0 sm:$0xff] }
 0x194   :  { %v178_v3 = vsel %vm177_vm6, %v460_v54, %v174_v0 }
 0x195   :  { %v179_v4 = vmul.f32 %v178_v3, %v159_v30  ;;  %v308_v30 = vld [vmem:[#allocation2 + $0x248] sm:$0xff]  ;;  %v388_v3 = vld [vmem:[#allocation2 + $0x2f8] sm:$0xff] }
 0x196   :  { %323 = vmatpush.msrb.mxu0 %v308_v30  ;;  %391 = vmatpush.msrb.mxu1 %v388_v3  ;;  %v376_v30 = vld [vmem:[#allocation2 + $0x298] sm:$0xff] }
 0x197   :  { %v181_v7 = vmul.f32 %v445_v1, %v179_v4 }
 0x198   :  { %324 = vmatpush.msrb.mxu0 %v307_v32  ;;  %392 = vmatpush.msrb.mxu1 %v387_v6 }
 0x199   :  { %v183_v8 = vadd.f32 %v446_v5, %v181_v7 }
 0x19a   :  { %325 = vmatpush.msrb.mxu0 %v306_v34 }
 0x19b   :  { %v184_v9 = vmax.f32 %v183_v8, 0.0  ;;  %v386_v8 = vld [vmem:[#allocation2 + $0x2e8] sm:$0xff] }
 0x19c   :  { %326 = vmatpush.msrb.mxu0 %v305_v36  ;;  %393 = vmatpush.msrb.mxu1 %v386_v8 }
 0x19d   :  { %220 = vmatmul.f32.vlgmr.msra.gmra.mxu2 %v184_v9 }
 0x19e   :  { %327 = vmatpush.msrb.mxu0 %v304_v38  ;;  %394 = vmatpush.msrb.mxu1 %v385_v10 }
 0x1a0   :  { %328 = vmatpush.msrb.mxu0 %v303_v41 }
 0x1a2   :  { %329 = vmatpush.msrb.mxu0 %v302_v43 }
 0x1a4   :  { %330 = vmatpush.msrb.mxu0 %v301_v44 }
 0x1a6   :  { %331 = vmatpush.msrb.mxu0 %v300_v46 }
 0x1a8   :  { %332 = vmatpush.msrb.mxu0 %v299_v48 }
 0x220   :  { %v221_v13 = vpop.f32.mrf.mxu2 }
 0x221   :  { %v551_v14 = vadd.f32 %v447_v12, %v221_v13  ;;  %v384_v12 = vld [vmem:[#allocation2 + $0x2d8] sm:$0xff] }
 0x222   :  { %395 = vmatpush.msrb.mxu1 %v384_v12 }
 0x223   :  { %259 = vmatmul.f32.vlgmr.msra.gmra.mxu3 %v551_v14 }
 0x2a6   :  { %v260_v18 = vpop.f32.mrf.mxu3 }
 0x2a7   :  { %v261_v19 = vadd.f32 %v448_v15, %v260_v18  ;;  %v383_v15 = vld [vmem:[#allocation2 + $0x2d0] sm:$0xff]  ;;  %v382_v18 = vld [vmem:[#allocation2 + $0x2c8] sm:$0xff] }
 0x2a8   :  { %396 = vmatpush.msrb.mxu1 %v383_v15 }
 0x2a9   :  { %v265_v21 = vrot.slane %v261_v19, 4 }
 0x2aa   :  { %397 = vmatpush.msrb.mxu1 %v382_v18 }
 0x2ab   :  { %v266_v23 = vadd.f32 %v265_v21, %v261_v19 }
 0x2ac   :  { %398 = vmatpush.msrb.mxu1 %v381_v20 }
 0x2ad   :  { %v267_v25 = vrot.slane %v266_v23, 2 }
 0x2ae   :  { %399 = vmatpush.msrb.mxu1 %v380_v22 }
 0x2af   :  { %v268_v27 = vadd.f32 %v267_v25, %v266_v23 }
 0x2b0   :  { %400 = vmatpush.msrb.mxu1 %v379_v24 }
 0x2b1   :  { %v269_v29 = vrot.slane %v268_v27, 1 }
 0x2b2   :  { %401 = vmatpush.msrb.mxu1 %v378_v26 }
 0x2b3   :  { %v270_v31 = vadd.f32 %v269_v29, %v268_v27 }
 0x2b4   :  { %402 = vmatpush.msrb.mxu1 %v377_v28 }
 0x2b5   :  { %v271_v33 = vmul.f32 %v270_v31, %v527_v39  ;;  %v375_v31 = vld [vmem:[#allocation2 + $0x290] sm:$0xff] }
 0x2b6   :  { %403 = vmatpush.msrb.mxu1 %v376_v30 }
 0x2b7   :  { %v272_v35 = vsub.f32 %v261_v19, %v271_v33  ;;  %v374_v33 = vld [vmem:[#allocation2 + $0x288] sm:$0xff] }
 0x2b8   :  { %404 = vmatpush.msrb.mxu1 %v375_v31 }
 0x2b9   :  { %v273_v37 = vmul.f32 %v272_v35, %v272_v35 }
 0x2ba   :  { %405 = vmatpush.msrb.mxu1 %v374_v33 }
 0x2bb   :  { %v274_v40 = vrot.slane %v273_v37, 4 }
 0x2bd   :  { %v275_v42 = vadd.f32 %v274_v40, %v273_v37 }
 0x2bf   :  { %v276_v45 = vrot.slane %v275_v42, 2 }
 0x2c1   :  { %v277_v47 = vadd.f32 %v276_v45, %v275_v42 }
 0x2c3   :  { %v278_v49 = vrot.slane %v277_v47, 1 }
 0x2c5   :  { %v279_v50 = vadd.f32 %v278_v49, %v277_v47  ;;  %v452_v47 = vld [vmem:[%s589_s2 + $0xb] ss:$0 sm:$0xff] }
 0x2c7   :  { %v280_v51 = vmul.f32 %v279_v50, %v527_v39 }
 0x2c9   :  { %v281_v52 = vadd.f32 1e-05, %v280_v51 }
 0x2cb   :  { %461 = vrsqrt.f32 %v281_v52  ;;  %vm288_vm8 = vweird.f32 %v281_v52 }
 0x2d1   :  { %v462_v53 = vpop.eup %461 }
 0x2d2   :  { %v283_v54 = vmul.f32 %v462_v53, %v281_v52  ;;  %vm289_vm7 = vweird.f32 %v462_v53 }
 0x2d3   :  { %vm290_vm9 = vmor %vm288_vm8, %vm289_vm7 }
 0x2d4   :  { %v284_v55 = vmul.f32 %v462_v53, %v283_v54 }
 0x2d6   :  { %v285_v56 = vmul.f32 0.5, %v284_v55 }
 0x2d8   :  { %v286_v57 = vsub.f32 1.5, %v285_v56 }
 0x2da   :  { %v287_v58 = vmul.f32 %v462_v53, %v286_v57 }
 0x2dc   :  { %v291_v60 = vsel %vm290_vm9, %v462_v53, %v287_v58  ;;  %v454_v53 = vld [vmem:[%s589_s2 + $0xd] ss:$0 sm:$0xff] }
 0x2dd   :  { %v292_v61 = vmul.f32 %v291_v60, %v272_v35  ;;  %v373_v35 = vld [vmem:[#allocation2 + $0x280] sm:$0xff] }
 0x2de   :  { %406 = vmatpush.msrb.mxu1 %v373_v35 }
 0x2df   :  { %v294_v63 = vmul.f32 %v449_v59, %v292_v61 }
 0x2e1   :  { %v296_v0 = vadd.f32 %v450_v62, %v294_v63 }
 0x2e3   :  { %v297_v1 = vmax.f32 %v296_v0, 0.0 }
 0x2e5   :  { %333 = vmatmul.f32.vlgmr.msrb.gmra.mxu0 %v297_v1  ;;  %v423_v1 = vlaneseq }
 0x362   :  { %v334_v4 = vpop.f32.mrf.mxu0 }
 0x363   :  { %v335_v5 = vadd.f32 %v451_v2, %v334_v4  ;;  %v424_v2 = vand.u32 127, %v423_v1 }
 0x365   :  { %v339_v7 = vrot.slane %v335_v5, 4  ;;  %vm425_vm13 = vcmp.eq.s32.totalorder %v424_v2, 2 }
 0x367   :  { %v340_v9 = vadd.f32 %v339_v7, %v335_v5 }
 0x369   :  { %v341_v11 = vrot.slane %v340_v9, 2 }
 0x36b   :  { %v342_v13 = vadd.f32 %v341_v11, %v340_v9 }
 0x36d   :  { %v343_v17 = vrot.slane %v342_v13, 1 }
 0x36f   :  { %v344_v19 = vadd.f32 %v343_v17, %v342_v13 }
 0x371   :  { %v345_v21 = vmul.f32 %v344_v19, %v527_v39 }
 0x373   :  { %v346_v23 = vsub.f32 %v335_v5, %v345_v21 }
 0x375   :  { %v347_v25 = vmul.f32 %v346_v23, %v346_v23 }
 0x377   :  { %v348_v27 = vrot.slane %v347_v25, 4 }
 0x379   :  { %v349_v29 = vadd.f32 %v348_v27, %v347_v25 }
 0x37b   :  { %v350_v32 = vrot.slane %v349_v29, 2 }
 0x37d   :  { %v351_v34 = vadd.f32 %v350_v32, %v349_v29 }
 0x37f   :  { %v352_v36 = vrot.slane %v351_v34, 1 }
 0x381   :  { %v353_v37 = vadd.f32 %v352_v36, %v351_v34 }
 0x383   :  { %v354_v38 = vmul.f32 %v353_v37, %v527_v39  ;;  %v453_v39 = vld [vmem:[%s589_s2 + $0xc] ss:$0 sm:$0xff] }
 0x385   :  { %v355_v40 = vadd.f32 1e-05, %v354_v38 }
 0x387   :  { %463 = vrsqrt.f32 %v355_v40  ;;  %vm362_vm11 = vweird.f32 %v355_v40 }
 0x38d   :  { %v464_v41 = vpop.eup %463 }
 0x38e   :  { %v357_v42 = vmul.f32 %v464_v41, %v355_v40  ;;  %vm363_vm10 = vweird.f32 %v464_v41 }
 0x38f   :  { %vm364_vm12 = vmor %vm362_vm11, %vm363_vm10 }
 0x390   :  { %v358_v43 = vmul.f32 %v464_v41, %v357_v42 }
 0x392   :  { %v359_v44 = vmul.f32 0.5, %v358_v43 }
 0x394   :  { %v360_v45 = vsub.f32 1.5, %v359_v44 }
 0x396   :  { %v361_v46 = vmul.f32 %v464_v41, %v360_v45 }
 0x398   :  { %v365_v48 = vsel %vm364_vm12, %v464_v41, %v361_v46 }
 0x399   :  { %v366_v49 = vmul.f32 %v365_v48, %v346_v23 }
 0x39b   :  { %v368_v50 = vmul.f32 %v452_v47, %v366_v49 }
 0x39d   :  { %v370_v51 = vadd.f32 %v453_v39, %v368_v50 }
 0x39f   :  { %v371_v52 = vmax.f32 %v370_v51, 0.0 }
 0x3a1   :  { %407 = vmatmul.f32.vlgmr.msrb.gmra.mxu1 %v371_v52 }
 0x41e   :  { %v408_v54 = vpop.f32.mrf.mxu1 }
 0x41f   :  { %v409_v55 = vadd.f32 %v454_v53, %v408_v54 }
 0x421   :  { %428 = vst [vmem:[%s590_s3] sm:$0xff] %v409_v55  ;;  %v411_v56 = vsub.f32 %v521_v16, %v409_v55 }
 0x423   :  { %v412_v57 = vmul.f32 %v411_v56, %v411_v56 }
 0x425   :  { %413 = vadd.xlane.f32.xlu0 %v412_v57 }
 0x498   :  { %v414_v58 = vpop.xlane.xlu0 %413 }
 0x499   :  { %v415_v59 = vrot.slane %v414_v58, 4 }
 0x49b   :  { %v416_v60 = vadd.f32 %v415_v59, %v414_v58 }
 0x49d   :  { %v417_v61 = vrot.slane %v416_v60, 2 }
 0x49f   :  { %v418_v62 = vadd.f32 %v417_v61, %v416_v60 }
 0x4a1   :  { %v419_v63 = vrot.slane %v418_v62, 1 }
 0x4a3   :  { %v420_v0 = vadd.f32 %v419_v63, %v418_v62 }
 0x4a5   :  { %435 = vpush %v420_v0 }
 0x4d6   :  { %s436_s2 = spop %435 }
 0x4d7   :  { %s422_s21 = smul.f32 0.0012376237, %s436_s2 }
 0x4d9   :  { %v426_v3 = vstv %s422_s21 }
 0x4da   :  { %v427_v4 = vsel %vm425_vm13, %v426_v3, %v551_v14 }
 0x4db   :  { %429 = vst [vmem:[%s590_s3 + $0x8] sm:$0xff] %v427_v4 }
 0x4dc   :  { %434 = vsyncpa [#allocation3], 1 }

</bundles_post_ra>
